<compile_context>
chip_gen: v7x
topology: tpu7x:2x2x1
jax: 0.10.0
libtpu: 0.0.40
codegen_flags: <defaults>
</compile_context>

<pallas_src>
import functools

import jax
import jax.numpy as jnp
import numpy as np
from jax.experimental import pallas as pl
from jax.experimental.pallas import tpu as pltpu

_LANE_TILE = 128  # batch tile for the lane-dense path


def _unique_channel_groups(weight, bias):
    """Group output channels whose (weight slice, bias) are bit-identical."""
    groups = {}
    order = []
    for co in range(weight.shape[0]):
        key = (np.ascontiguousarray(weight[co]).tobytes(), float(bias[co]))
        if key not in groups:
            groups[key] = []
            order.append(key)
        groups[key].append(co)
    return [groups[k] for k in order]


def _accumulate_group(load_tap, init_shape, weight_co, bias_co):
    """Shift-and-accumulate one unique output channel with constant taps."""
    cin, k, _ = weight_co.shape
    acc = jnp.full(init_shape, float(bias_co), dtype=jnp.float32)
    for ci in range(cin):
        for kh in range(k):
            for kw in range(k):
                wv = float(weight_co[ci, kh, kw])
                if wv == 0.0:
                    continue  # zero taps constant-folded away at trace time
                tap = load_tap(ci, kh, kw)
                if wv == 1.0:
                    acc = acc + tap
                elif wv == -1.0:
                    acc = acc - tap
                else:
                    acc = acc + wv * tap
    return acc


def _conv_kernel_nchw(x_ref, o_ref, *, weight, bias, groups):
    """Gridless whole-batch path. x:(N,Cin,H,W) -> o:(N,Cout,Hout,Wout)."""
    n, _, h, w = x_ref.shape
    cout = o_ref.shape[1]
    k = weight.shape[-1]
    hout, wout = h - k + 1, w - k + 1

    def load_tap(ci, kh, kw):
        # Offset loads straight from the ref (vld slots are idle here).
        return x_ref[:, ci, kh:kh + hout, kw:kw + wout]

    accs = [None] * cout
    for cos in groups:
        acc = _accumulate_group(load_tap, (n, hout, wout),
                                weight[cos[0]], bias[cos[0]])
        for c in cos:
            accs[c] = acc

    if len(groups) == 1:
        # All output channels identical: one contiguous full-ref store.
        o_ref[...] = jnp.broadcast_to(accs[0][:, None, :, :], o_ref.shape)
    else:
        for co in range(cout):
            o_ref[:, co, :, :] = accs[co]


def _conv_kernel_lane_dense(x_ref, o_ref, *, weight, bias, groups):
    """Lane-dense path. x:(Cin,H,W,TN) -> o:(Cout,Hout,Wout,TN), N in lanes."""
    _, h, w, tn = x_ref.shape
    cout = o_ref.shape[0]
    k = weight.shape[-1]
    hout, wout = h - k + 1, w - k + 1

    def load_tap(ci, kh, kw):
        # kh/kw are pure sublane/second-minor offsets; all 128 lanes used.
        return x_ref[ci, kh:kh + hout, kw:kw + wout, :]

    accs = [None] * cout
    for cos in groups:
        acc = _accumulate_group(load_tap, (hout, wout, tn),
                                weight[cos[0]], bias[cos[0]])
        for c in cos:
            accs[c] = acc

    if len(groups) == 1:
        o_ref[...] = jnp.broadcast_to(accs[0][None], o_ref.shape)
    else:
        for co in range(cout):
            o_ref[co, :, :, :] = accs[co]


def basic_conv_pallas(x, weight, bias):
    """BasicConvTestModel.forward(x) for NCHW float inputs."""
    weight = np.asarray(weight, dtype=np.float32)
    bias = np.asarray(bias, dtype=np.float32)
    n, cin, h, w = x.shape
    cout, cin_w, k, k2 = weight.shape
    assert cin == cin_w and k == k2
    hout, wout = h - k + 1, w - k + 1

    if x.dtype != jnp.float32:
        x = x.astype(jnp.float32)

    groups = _unique_channel_groups(weight, bias)
    nz_taps = sum(int(np.count_nonzero(weight[cos[0]])) for cos in groups)
    cost = pl.CostEstimate(
        flops=2 * max(nz_taps, 1) * n * hout * wout,
        transcendentals=0,
        bytes_accessed=(n * cin * h * w + n * cout * hout * wout) * 4,
    )

    if n >= _LANE_TILE and n % _LANE_TILE == 0:
        # Lane-dense path: N in the lane dimension + parallel batch grid
        # (pipelines DMA/compute, shards across v7x's two TensorCores).
        x_t = jnp.transpose(x, (1, 2, 3, 0))  # (Cin, H, W, N)
        kernel = functools.partial(_conv_kernel_lane_dense,
                                   weight=weight, bias=bias, groups=groups)
        out_t = pl.pallas_call(
            kernel,
            out_shape=jax.ShapeDtypeStruct((cout, hout, wout, n), jnp.float32),
            grid=(n // _LANE_TILE,),
            in_specs=[pl.BlockSpec((cin, h, w, _LANE_TILE),
                                   lambda i: (0, 0, 0, i))],
            out_specs=pl.BlockSpec((cout, hout, wout, _LANE_TILE),
                                   lambda i: (0, 0, 0, i)),
            compiler_params=pltpu.CompilerParams(
                dimension_semantics=("parallel",)),
            cost_estimate=cost,
        )(x_t)
        return jnp.transpose(out_t, (3, 0, 1, 2))  # back to NCHW

    # Small-batch path: whole batch resident in VMEM, single invocation
    # (launch-bound at the spec'd (2,1,16,16) shape; no grid overhead).
    kernel = functools.partial(_conv_kernel_nchw,
                               weight=weight, bias=bias, groups=groups)
    return pl.pallas_call(
        kernel,
        out_shape=jax.ShapeDtypeStruct((n, cout, hout, wout), jnp.float32),
        in_specs=[pl.BlockSpec(memory_space=pltpu.MemorySpace.VMEM)],
        out_specs=pl.BlockSpec(memory_space=pltpu.MemorySpace.VMEM),
        cost_estimate=cost,
    )(x)


def make_params(in_channels=1, out_channels=2, kernel_size=2,
                weight_init=-1.0, bias_init=-2.0):
    """Deterministic params matching fill_conv_weight / fill_bias."""
    w = np.full((out_channels, in_channels, kernel_size, kernel_size),
                weight_init, dtype=np.float32)
    w = w + np.eye(kernel_size, dtype=np.float32)  # broadcasts over (out, in)
    b = np.full((out_channels,), bias_init, dtype=np.float32)
    return w, b


def basic_conv_test_model(x):
    w, b = make_params()
    return basic_conv_pallas(x, w, b)


def _reference(x):
    """Pure-JAX reference (lax conv) for correctness check."""
    w, b = make_params()
    out = jax.lax.conv_general_dilated(
        x.astype(jnp.float32), jnp.asarray(w), window_strides=(1, 1),
        padding="VALID", dimension_numbers=("NCHW", "OIHW", "NCHW"))
    return out + jnp.asarray(b)[None, :, None, None]


if __name__ == "__main__":
    key = jax.random.PRNGKey(0)
    k_small, k_big = jax.random.split(key)

    # Spec'd small shape: batch=2, in_channels=1, spatial=16 (gridless path).
    x_small = jax.random.normal(k_small, (2, 1, 16, 16), dtype=jnp.float32)
    out_s = jax.block_until_ready(basic_conv_test_model(x_small))
    ref_s = _reference(x_small)
    assert out_s.shape == (2, 2, 15, 15), out_s.shape
    assert np.allclose(np.asarray(out_s), np.asarray(ref_s), atol=1e-5, rtol=1e-5)

    # Larger batch exercises the lane-dense + parallel-grid path.
    x_big = jax.random.normal(k_big, (256, 1, 16, 16), dtype=jnp.float32)
    out_b = jax.block_until_ready(basic_conv_test_model(x_big))
    ref_b = _reference(x_big)
    assert out_b.shape == (256, 2, 15, 15), out_b.shape
    assert np.allclose(np.asarray(out_b), np.asarray(ref_b), atol=1e-5, rtol=1e-5)

    print("KERNEL_OK")
</pallas_src>

<mosaic_0001>
module attributes {stable_mosaic.version = 11 : i64} {
  func.func @_conv_kernel_nchw(%arg0: memref<2x1x16x16xf32, #tpu.memory_space<vmem>>, %arg1: memref<2x2x15x15xf32, #tpu.memory_space<vmem>>) attributes {dimension_semantics = [], scalar_prefetch = 0 : i64, scratch_operands = 0 : i64, tpu.core_type = #tpu.core_type<tc>} {
    %cst = arith.constant -2.000000e+00 : f32
    %0 = vector.broadcast %cst : f32 to vector<2x15x15xf32>
    %c0 = arith.constant 0 : index
    %c0_0 = arith.constant 0 : index
    %c0_1 = arith.constant 0 : index
    %c1 = arith.constant 1 : index
    %1 = vector.load %arg0[%c0, %c0_0, %c0_1, %c1] : memref<2x1x16x16xf32, #tpu.memory_space<vmem>>, vector<2x1x15x15xf32>
    %2 = vector.shape_cast %1 : vector<2x1x15x15xf32> to vector<2x15x15xf32>
    %3 = arith.subf %0, %2 : vector<2x15x15xf32>
    %c0_2 = arith.constant 0 : index
    %c0_3 = arith.constant 0 : index
    %c1_4 = arith.constant 1 : index
    %c0_5 = arith.constant 0 : index
    %4 = vector.load %arg0[%c0_2, %c0_3, %c1_4, %c0_5] : memref<2x1x16x16xf32, #tpu.memory_space<vmem>>, vector<2x1x15x15xf32>
    %5 = vector.shape_cast %4 : vector<2x1x15x15xf32> to vector<2x15x15xf32>
    %6 = arith.subf %3, %5 : vector<2x15x15xf32>
    %7 = vector.shape_cast %6 : vector<2x15x15xf32> to vector<2x1x15x15xf32>
    %8 = vector.shape_cast %7 : vector<2x1x15x15xf32> to vector<2x1x15x15xf32>
    %9 = vector.broadcast %8 : vector<2x1x15x15xf32> to vector<2x2x15x15xf32>
    %c0_6 = arith.constant 0 : index
    %c0_7 = arith.constant 0 : index
    %c0_8 = arith.constant 0 : index
    %c0_9 = arith.constant 0 : index
    %10 = vector.load %arg1[%c0_6, %c0_7, %c0_8, %c0_9] : memref<2x2x15x15xf32, #tpu.memory_space<vmem>>, vector<2x2x15x15xf32>
    tpu.vector_store %arg1[%c0_6, %c0_7, %c0_8, %c0_9], %9 {strides = array<i32>} : memref<2x2x15x15xf32, #tpu.memory_space<vmem>>, vector<2x2x15x15xf32>,
    return
  }
}

</mosaic_0001>

<bundles_post_ra>
// kernel: tpu_custom_call.1
= control target key start
LH: loop header
LB: loop body
LE: loop exit
PB: predicated region body
PF: predicated region fallthrough
CT: control target
= control target key end

     0   :  { %6 = vsyncpa [#allocation3], 0  ;;  %s114_s6 = smov [#allocation2]   ;;  %s165_s0 = inlined_call_operand.hbm [shape: f32[2,1,16,16], index: 0, kind: input, shape index: {}]   ;;  %s166_s1 = inlined_call_operand.vmem [shape: f32[2,2,15,15], index: 1, kind: output, shape index: {}]  }
   0x1   :  { %s12_s7 = sshll.u32 %s114_s6, 4  ;;  %s90_s10 = scalar_lea.hbm %s165_s0, 512  ;;  %s13_s7 = int_to_ptr.vmem [resolvable:$true] %s12_s7 }
   0x2   :  { %p91_p0 = scmp.ne.s32.totalorder %s165_s0, %s90_s10  ;;  %p94_p1 = scmp.lt.u32.totalorder %s90_s10, %s165_s0 }
   0x4   :  { %p96_p2 = pnand %p94_p1, %p91_p0 }
   0x6   :  { %99 = shalt.err (!%p96_p2)
}
   0x7   :  { %s100_s15 = scalar_lea.vmem %s13_s7, 512  ;;  %p105_p4 = scmp.lt.s32.totalorder %s13_s7, %s13_s7 }
   0x8   :  { %p101_p3 = scmp.ne.s32.totalorder %s13_s7, %s100_s15  ;;  %p106_p5 = scmp.lt.s32.totalorder %s100_s15, %s100_s15 }
   0xa   :  { %p107_p6 = por %p106_p5, %p105_p4 }
   0xc   :  { %p108_p7 = pnand %p107_p6, %p101_p3 }
   0xe   :  { %111 = shalt.err (!%p108_p7)
}
   0xf   :  { %s115_s16 = smov 128   ;;  %s116_s17 = smov 8  }
  0x10   :  { %18 = dma.hbm_to_vmem [thread:$0]  %s165_s0, 512, %s13_s7, [#allocation3], %s115_s16, %s115_s16, %s116_s17  }
  0x11   :  { %112 = dma.done.wait [#allocation3], 512  }
  0x12   :  { %113 = vsyncadd [#allocation3], 4294966784  ;;  %v30_v0 = vld [vmem:[#allocation2 + $0x1] sm:$0xff]  ;;  %v32_v1 = vld [vmem:[#allocation2 + $0x11] sm:$0xff]  ;;  %s117_s20 = smov 1   ;;  %s118_s0 = smov 127  }
  0x13   :  { %38 = vrot.lane.b32.xlu0 %v30_v0, %s117_s20  ;;  %42 = vrot.lane.b32.xlu1 %v32_v1, %s117_s20  ;;  %v31_v2 = vld [vmem:[#allocation2 + $0x9] sm:$0x7f]  ;;  %v33_v3 = vld [vmem:[#allocation2 + $0x19] sm:$0x7f]  ;;  %v22_v4 = vld [vmem:[#allocation2] sm:$0xff]  ;;  %vm70_vm0 = vcmask 121856  }
  0x14   :  { %v24_v5 = vld [vmem:[#allocation2 + $0x10] sm:$0xff]  ;;  %v26_v6 = vsub.f32 -2.0, %v22_v4  ;;  %v23_v7 = vld [vmem:[#allocation2 + $0x8] sm:$0x7f]  ;;  %v25_v11 = vld [vmem:[#allocation2 + $0x18] sm:$0x7f] }
  0x15   :  { %v28_v8 = vsub.f32 -2.0, %v24_v5  ;;  %v27_v13 = vsub.f32 -2.0, %v23_v7  ;;  %v29_v15 = vsub.f32 -2.0, %v25_v11  ;;  %vm72_vm1 = vcmask 120832  }
  0x17   :  { %40 = vrot.lane.b32.xlu0 %v31_v2, %s117_s20  ;;  %44 = vrot.lane.b32.xlu1 %v33_v3, %s117_s20 }
  0x85   :  { %v39_v9 = vpop.permute.xlu0 %38  ;;  %v43_v10 = vpop.permute.xlu1 %42 }
  0x86   :  { %v50_v12 = vsub.f32 %v26_v6, %v39_v9  ;;  %v52_v14 = vsub.f32 %v28_v8, %v43_v10 }
  0x88   :  { %58 = vrot.lane.b32.xlu0 %v50_v12, %s118_s0 }
  0x89   :  { %v41_v16 = vpop.permute.xlu0 %40  ;;  %v45_v17 = vpop.permute.xlu1 %44 }
  0x8a   :  { %v51_v18 = vsub.f32 %v27_v13, %v41_v16  ;;  %v53_v19 = vsub.f32 %v29_v15, %v45_v17 }
  0x8c   :  { %60 = vrot.lane.b32.xlu1 %v51_v18, %s118_s0  ;;  %62 = vrot.lane.b32.xlu0 %v52_v14, %s118_s0 }
  0x90   :  { %64 = vrot.lane.b32.xlu1 %v53_v19, %s118_s0 }
  0xfa   :  { %v59_v20 = vpop.permute.xlu0 %58 }
  0xfb   :  { %71 = vst.msk [vmem:[%s166_s1] sm:$0xff] %vm70_vm0, %v59_v20  ;;  %74 = vst.msk [vmem:[%s166_s1 + $0x10] sm:$0xff] %vm70_vm0, %v59_v20 }
  0xfe   :  { %v61_v21 = vpop.permute.xlu1 %60  ;;  %v63_v22 = vpop.permute.xlu0 %62 }
  0xff   :  { %73 = vst.msk [vmem:[%s166_s1 + $0x8] sm:$0x7f] %vm72_vm1, %v61_v21  ;;  %75 = vst.msk [vmem:[%s166_s1 + $0x18] sm:$0x7f] %vm72_vm1, %v61_v21 }
 0x100   :  { %76 = vst.msk [vmem:[%s166_s1 + $0x20] sm:$0xff] %vm70_vm0, %v63_v22  ;;  %78 = vst.msk [vmem:[%s166_s1 + $0x30] sm:$0xff] %vm70_vm0, %v63_v22 }
 0x102   :  { %v65_v23 = vpop.permute.xlu1 %64 }
 0x103   :  { %77 = vst.msk [vmem:[%s166_s1 + $0x28] sm:$0x7f] %vm72_vm1, %v65_v23  ;;  %79 = vst.msk [vmem:[%s166_s1 + $0x38] sm:$0x7f] %vm72_vm1, %v65_v23 }
 0x104   :  { %84 = vsyncpa [#allocation3], 1 }

</bundles_post_ra>
